<compile_context>
chip_gen: v5e
topology: v5e:2x2
jax: 0.10.0
libtpu: 0.0.40
codegen_flags: <defaults>
</compile_context>

<pallas_src>
import functools

import jax
import jax.numpy as jnp
import numpy as np
from jax import lax
from jax.experimental import pallas as pl
from jax.experimental.pallas import tpu as pltpu


# ---------------------------------------------------------------------------
# Kernels
# ---------------------------------------------------------------------------
def _ce_kernel_hard(x_ref, lbl_ref, loss_ref, m_sc, l_sc, sx_sc, xy_sc,
                    *, epsilon: float, num_classes: int, tc: int):
    """Online-over-class-chunks CE from int32 ids, with fused label smoothing."""
    c = pl.program_id(1)
    last_c = pl.num_programs(1) - 1
    ragged = (num_classes % tc) != 0          # trace-time constant

    @pl.when(c == 0)
    def _init():
        m_sc[...] = jnp.full(m_sc.shape, -jnp.inf, dtype=m_sc.dtype)
        l_sc[...] = jnp.zeros(l_sc.shape, dtype=l_sc.dtype)
        sx_sc[...] = jnp.zeros(sx_sc.shape, dtype=sx_sc.dtype)
        xy_sc[...] = jnp.zeros(xy_sc.shape, dtype=xy_sc.dtype)

    x = x_ref[...]                             # (tn, tc) native dtype, cast per use
    lbl = lbl_ref[...]                         # (tn, 1) int32
    col = c * tc + lax.broadcasted_iota(jnp.int32, (1, tc), 1)   # (1, tc)

    if ragged:
        valid = col < num_classes
        x_for_max = jnp.where(valid, x, jnp.array(-jnp.inf, dtype=x.dtype))
    else:
        x_for_max = x

    # online log-sum-exp over class chunks
    m_old = m_sc[...]
    m_new = jnp.maximum(
        m_old, jnp.max(x_for_max, axis=-1, keepdims=True).astype(jnp.float32))
    l_sc[...] = (jnp.exp(m_old - m_new) * l_sc[...]
                 + jnp.sum(jnp.exp(x_for_max.astype(jnp.float32) - m_new),
                           axis=-1, keepdims=True))
    m_sc[...] = m_new

    # x[row, label[row]] via iota==label select (no gather, no one-hot in HBM);
    # labels are < num_classes so garbage columns of a ragged chunk never match.
    xy_sc[...] += jnp.sum(jnp.where(col == lbl, x, jnp.array(0, dtype=x.dtype)),
                          axis=-1, keepdims=True, dtype=jnp.float32)

    if epsilon:
        xz = (jnp.where(valid, x, jnp.array(0, dtype=x.dtype)) if ragged else x)
        sx_sc[...] += jnp.sum(xz, axis=-1, keepdims=True, dtype=jnp.float32)

    @pl.when(c == last_c)
    def _finalize():
        mlse = m_sc[...] + jnp.log(l_sc[...])            # (tn, 1)
        loss = mlse - xy_sc[...]                         # -log p[y]
        if epsilon:
            smooth = num_classes * mlse - sx_sc[...]     # -sum(log p)
            loss = (1.0 - epsilon) * loss + (epsilon / num_classes) * smooth
        loss_ref[...] = loss


def _ce_kernel_soft(x_ref, t_ref, loss_ref, m_sc, l_sc, sx_sc, st_sc, stx_sc,
                    *, epsilon: float, num_classes: int, tc: int):
    """CE against a given soft target distribution, optional fused smoothing."""
    c = pl.program_id(1)
    last_c = pl.num_programs(1) - 1
    ragged = (num_classes % tc) != 0

    @pl.when(c == 0)
    def _init():
        m_sc[...] = jnp.full(m_sc.shape, -jnp.inf, dtype=m_sc.dtype)
        for r in (l_sc, sx_sc, st_sc, stx_sc):
            r[...] = jnp.zeros(r.shape, dtype=r.dtype)

    x = x_ref[...]
    t = t_ref[...]
    if ragged:
        col = c * tc + lax.broadcasted_iota(jnp.int32, (1, tc), 1)
        valid = col < num_classes
        x_for_max = jnp.where(valid, x, jnp.array(-jnp.inf, dtype=x.dtype))
        xz = jnp.where(valid, x, jnp.array(0, dtype=x.dtype))
        tz = jnp.where(valid, t, jnp.array(0, dtype=t.dtype))
    else:
        x_for_max, xz, tz = x, x, t

    m_old = m_sc[...]
    m_new = jnp.maximum(
        m_old, jnp.max(x_for_max, axis=-1, keepdims=True).astype(jnp.float32))
    l_sc[...] = (jnp.exp(m_old - m_new) * l_sc[...]
                 + jnp.sum(jnp.exp(x_for_max.astype(jnp.float32) - m_new),
                           axis=-1, keepdims=True))
    m_sc[...] = m_new

    st_sc[...] += jnp.sum(tz, axis=-1, keepdims=True, dtype=jnp.float32)
    stx_sc[...] += jnp.sum(tz.astype(jnp.float32) * xz.astype(jnp.float32),
                           axis=-1, keepdims=True)
    if epsilon:
        sx_sc[...] += jnp.sum(xz, axis=-1, keepdims=True, dtype=jnp.float32)

    @pl.when(c == last_c)
    def _finalize():
        mlse = m_sc[...] + jnp.log(l_sc[...])
        loss = mlse * st_sc[...] - stx_sc[...]           # -sum(t * log p)
        if epsilon:
            smooth = num_classes * mlse - sx_sc[...]
            loss = (1.0 - epsilon) * loss + (epsilon / num_classes) * smooth
        loss_ref[...] = loss


def _ce_kernel_soft_softmax(x_ref, t_ref, loss_ref, m_sc, l_sc, tm_sc, tl_sc, td_sc,
                            *, num_classes: int, tc: int):
    """CE against softmax(target): online softmax of t folded into row scalars."""
    c = pl.program_id(1)
    last_c = pl.num_programs(1) - 1
    ragged = (num_classes % tc) != 0

    @pl.when(c == 0)
    def _init():
        m_sc[...] = jnp.full(m_sc.shape, -jnp.inf, dtype=m_sc.dtype)
        tm_sc[...] = jnp.full(tm_sc.shape, -jnp.inf, dtype=tm_sc.dtype)
        for r in (l_sc, tl_sc, td_sc):
            r[...] = jnp.zeros(r.shape, dtype=r.dtype)

    x = x_ref[...]
    t = t_ref[...]
    if ragged:
        col = c * tc + lax.broadcasted_iota(jnp.int32, (1, tc), 1)
        valid = col < num_classes
        x_for_max = jnp.where(valid, x, jnp.array(-jnp.inf, dtype=x.dtype))
        xz = jnp.where(valid, x, jnp.array(0, dtype=x.dtype)).astype(jnp.float32)
        t_for_max = jnp.where(valid, t, jnp.array(-jnp.inf, dtype=t.dtype))
    else:
        x_for_max = x
        xz = x.astype(jnp.float32)
        t_for_max = t

    # online log-sum-exp of the logits
    m_old = m_sc[...]
    m_new = jnp.maximum(
        m_old, jnp.max(x_for_max, axis=-1, keepdims=True).astype(jnp.float32))
    l_sc[...] = (jnp.exp(m_old - m_new) * l_sc[...]
                 + jnp.sum(jnp.exp(x_for_max.astype(jnp.float32) - m_new),
                           axis=-1, keepdims=True))
    m_sc[...] = m_new

    # online softmax(t) dotted with x, never materializing the normalized target
    tm_old = tm_sc[...]
    tm_new = jnp.maximum(
        tm_old, jnp.max(t_for_max, axis=-1, keepdims=True).astype(jnp.float32))
    beta = jnp.exp(tm_old - tm_new)
    p = jnp.exp(t_for_max.astype(jnp.float32) - tm_new)      # invalid lanes -> 0
    tl_sc[...] = beta * tl_sc[...] + jnp.sum(p, axis=-1, keepdims=True)
    td_sc[...] = beta * td_sc[...] + jnp.sum(p * xz, axis=-1, keepdims=True)
    tm_sc[...] = tm_new

    @pl.when(c == last_c)
    def _finalize():
        mlse = m_sc[...] + jnp.log(l_sc[...])
        d = td_sc[...] * pl.reciprocal(tl_sc[...], approx=False)
        loss_ref[...] = mlse - d            # softmax(t) sums to 1


# ---------------------------------------------------------------------------
# Tiling / VMEM budgets
# ---------------------------------------------------------------------------
_MAX_TC = 2048          # class-chunk width (lanes) for large vocabularies


def _round_up(v, m):
    return ((v + m - 1) // m) * m


def _vmem_params():
    """Per-generation VMEM limit + block budget (v7x has half the VMEM of v5e/v6e)."""
    cap = 64 * 1024 * 1024                               # conservative fallback
    try:
        info = pltpu.get_tpu_info()
        cap = int(getattr(info, "vmem_capacity_bytes", cap)) or cap
    except Exception:
        pass
    limit = min(cap * 7 // 10, 64 * 1024 * 1024)         # 64 MiB on 128-MiB parts, ~45 MiB on v7x
    budget = limit * 6 // 10                             # headroom for temporaries / compiler scratch
    return int(limit), int(budget)


def _pick_tiles(N, C, x_itemsize, t_itemsize, n_acc, budget, max_tc=_MAX_TC):
    """Row/class tile sizes sized against the per-generation VMEM budget."""
    if C <= max_tc:
        tc = C                                           # single class chunk (full dim allowed)
    else:
        tc = max(128, (max_tc // 128) * 128)             # chunked C must be lane-aligned

    if N < 8:
        return N, tc                                     # tiny row extent: block == array

    # Per-row VMEM bytes: double-buffered streamed chunks, f32 chunk temporaries,
    # and lane-padded (tn, 1) label/output blocks + scratch accumulators.
    per_row = 2 * tc * x_itemsize                        # logits chunk, double buffered
    per_row += 2 * tc * t_itemsize                       # soft-target chunk (0 for hard labels)
    per_row += 2 * tc * 4                                # headroom for f32 temporaries (exp / masks)
    per_row += (4 + n_acc) * 128 * 4                     # (tn,1) blocks + scratch, lane-padded

    tn = max(8, budget // max(per_row, 1))
    tn = min(tn, 512, _round_up(N, 8))
    if N >= 32:
        # keep >= 4 row-grid steps: megacore sharding (v7x) + real prefetch overlap
        tn = min(tn, max(8, _round_up(-(-N // 4), 8)))
    tn = (tn // 32) * 32 if tn >= 32 else max(8, (tn // 8) * 8)
    return int(tn), int(tc)


def _compiler_params(vmem_limit):
    return pltpu.CompilerParams(
        dimension_semantics=("parallel", "arbitrary"),
        vmem_limit_bytes=vmem_limit,
    )


# ---------------------------------------------------------------------------
# Wrappers
# ---------------------------------------------------------------------------
def _ce_rows_hard(x, labels, epsilon, max_tc=_MAX_TC):
    """x: (N, C) logits, labels: (N,) int class ids -> per-row loss (N,), f32."""
    N, C = x.shape
    labels = labels.reshape(N, 1).astype(jnp.int32)
    limit, budget = _vmem_params()
    tn, tc = _pick_tiles(N, C, x.dtype.itemsize, 0, 4, budget, max_tc)
    kernel = functools.partial(_ce_kernel_hard, epsilon=float(epsilon or 0.0),
                               num_classes=C, tc=tc)
    out = pl.pallas_call(
        kernel,
        out_shape=jax.ShapeDtypeStruct((N, 1), jnp.float32),
        grid_spec=pltpu.PrefetchScalarGridSpec(
            num_scalar_prefetch=0,
            grid=(pl.cdiv(N, tn), pl.cdiv(C, tc)),
            in_specs=[
                pl.BlockSpec((tn, tc), lambda i, c: (i, c)),
                pl.BlockSpec((tn, 1), lambda i, c: (i, 0)),
            ],
            out_specs=pl.BlockSpec((tn, 1), lambda i, c: (i, 0)),
            scratch_shapes=[pltpu.VMEM((tn, 1), jnp.float32)] * 4,
        ),
        compiler_params=_compiler_params(limit),
        cost_estimate=pl.CostEstimate(
            flops=6 * N * C,
            transcendentals=N * C,
            bytes_accessed=N * C * x.dtype.itemsize + 8 * N),
    )(x, labels)
    return out[:, 0]


def _ce_rows_soft(x, target, epsilon, softmax_target, max_tc=_MAX_TC):
    """x: (N, C) logits, target: (N, C) soft target (pre-softmax iff softmax_target)."""
    N, C = x.shape
    limit, budget = _vmem_params()
    n_acc = 5
    tn, tc = _pick_tiles(N, C, x.dtype.itemsize, target.dtype.itemsize,
                         n_acc, budget, max_tc)
    if softmax_target:
        kernel = functools.partial(_ce_kernel_soft_softmax, num_classes=C, tc=tc)
        flops, trans = 10 * N * C, 2 * N * C
    else:
        kernel = functools.partial(_ce_kernel_soft, epsilon=float(epsilon or 0.0),
                                   num_classes=C, tc=tc)
        flops, trans = 8 * N * C, N * C
    out = pl.pallas_call(
        kernel,
        out_shape=jax.ShapeDtypeStruct((N, 1), jnp.float32),
        grid_spec=pltpu.PrefetchScalarGridSpec(
            num_scalar_prefetch=0,
            grid=(pl.cdiv(N, tn), pl.cdiv(C, tc)),
            in_specs=[
                pl.BlockSpec((tn, tc), lambda i, c: (i, c)),
                pl.BlockSpec((tn, tc), lambda i, c: (i, c)),
            ],
            out_specs=pl.BlockSpec((tn, 1), lambda i, c: (i, 0)),
            scratch_shapes=[pltpu.VMEM((tn, 1), jnp.float32)] * n_acc,
        ),
        compiler_params=_compiler_params(limit),
        cost_estimate=pl.CostEstimate(
            flops=flops,
            transcendentals=trans,
            bytes_accessed=N * C * (x.dtype.itemsize + target.dtype.itemsize) + 4 * N),
    )(x, target)
    return out[:, 0]


class CELoss:
    """JAX/Pallas port of the CELoss module (forward pass only)."""

    def __init__(self, epsilon=None):
        if epsilon is not None and (epsilon <= 0 or epsilon >= 1):
            epsilon = None
        self.epsilon = epsilon

    def __call__(self, x, label):
        C = x.shape[-1]
        x2 = x.reshape(-1, C)
        is_soft = (label.ndim == x.ndim and label.shape[-1] == C)

        if self.epsilon is not None:
            # label smoothing fused into the kernel; per-sample loss, no reduction
            if is_soft:
                return _ce_rows_soft(x2, label.reshape(-1, C),
                                     epsilon=self.epsilon, softmax_target=False)
            return _ce_rows_hard(x2, label.reshape(-1), epsilon=self.epsilon)
        else:
            if is_soft:
                loss = _ce_rows_soft(x2, label.reshape(-1, C),
                                     epsilon=0.0, softmax_target=True)
            else:
                loss = _ce_rows_hard(x2, label.reshape(-1), epsilon=0.0)
            # F.cross_entropy default reduction='mean'
            return jnp.mean(loss)


# ---------------------------------------------------------------------------
# Self-test
# ---------------------------------------------------------------------------
if __name__ == "__main__":
    key = jax.random.PRNGKey(0)
    keys = jax.random.split(key, 10)

    # --- Case A: 2-D logits, N=8, C=32 ---
    N, C = 8, 32
    x = jax.random.normal(keys[0], (N, C), dtype=jnp.float32)
    hard_label = jax.random.randint(keys[1], (N,), 0, C, dtype=jnp.int32)
    soft_logits = jax.random.normal(keys[2], (N, C), dtype=jnp.float32)
    logp = jax.nn.log_softmax(x, axis=-1)

    # path 1: label smoothing (epsilon=0.1), hard labels, per-sample losses
    ce_smooth = CELoss(epsilon=0.1)
    loss_smooth = jax.block_until_ready(ce_smooth(x, hard_label))
    oh = jax.nn.one_hot(hard_label, C, dtype=jnp.float32)
    ref_smooth = -jnp.sum((oh * 0.9 + 0.1 / C) * logp, axis=-1)
    assert np.allclose(np.asarray(loss_smooth), np.asarray(ref_smooth), atol=1e-5)

    # path 2: label smoothing with an already-soft (N, C) target
    soft_t = jax.nn.softmax(soft_logits, axis=-1)
    loss_soft_smooth = jax.block_until_ready(ce_smooth(x, soft_t))
    ref_soft_smooth = -jnp.sum((soft_t * 0.9 + 0.1 / C) * logp, axis=-1)
    assert np.allclose(np.asarray(loss_soft_smooth), np.asarray(ref_soft_smooth), atol=1e-5)

    # path 3: epsilon=None, hard labels, mean-reduced CE
    ce = CELoss(epsilon=None)
    loss_hard = jax.block_until_ready(ce(x, hard_label))
    ref_hard = jnp.mean(-jnp.take_along_axis(logp, hard_label[:, None], axis=-1)[:, 0])
    assert np.allclose(float(loss_hard), float(ref_hard), atol=1e-5)

    # path 4: epsilon=None, soft labels (softmaxed inside kernel), mean-reduced CE
    loss_soft = jax.block_until_ready(ce(x, soft_logits))
    ref_soft = jnp.mean(-jnp.sum(jax.nn.softmax(soft_logits, axis=-1) * logp, axis=-1))
    assert np.allclose(float(loss_soft), float(ref_soft), atol=1e-5)

    # --- Case B: 3-D logits with ragged row count (N = 2*5 = 10) ---
    B, S = 2, 5
    x3 = jax.random.normal(keys[3], (B, S, C), dtype=jnp.float32)
    hard3 = jax.random.randint(keys[4], (B, S), 0, C, dtype=jnp.int32)
    loss3 = jax.block_until_ready(ce(x3, hard3))
    lp3 = jax.nn.log_softmax(x3.reshape(-1, C), axis=-1)
    ref3 = jnp.mean(-jnp.take_along_axis(lp3, hard3.reshape(-1)[:, None], axis=-1)[:, 0])
    assert np.allclose(float(loss3), float(ref3), atol=1e-5)

    # --- Case C: exercise the chunked / ragged class-axis (C grid) path ---
    Nc, Cc = 64, 320                           # 3 chunks of 128; last chunk ragged
    xc = jax.random.normal(keys[5], (Nc, Cc), dtype=jnp.float32)
    lc = jax.random.randint(keys[6], (Nc,), 0, Cc, dtype=jnp.int32)
    lpc = jax.nn.log_softmax(xc, axis=-1)
    loss_c = jax.block_until_ready(_ce_rows_hard(xc, lc, epsilon=0.1, max_tc=128))
    ohc = jax.nn.one_hot(lc, Cc, dtype=jnp.float32)
    ref_c = -jnp.sum((ohc * 0.9 + 0.1 / Cc) * lpc, axis=-1)
    assert np.allclose(np.asarray(loss_c), np.asarray(ref_c), atol=1e-4)

    tgt_c = jax.random.normal(keys[7], (Nc, Cc), dtype=jnp.float32)
    loss_cs = jax.block_until_ready(
        _ce_rows_soft(xc, tgt_c, epsilon=0.0, softmax_target=True, max_tc=128))
    ref_cs = -jnp.sum(jax.nn.softmax(tgt_c, axis=-1) * lpc, axis=-1)
    assert np.allclose(np.asarray(loss_cs), np.asarray(ref_cs), atol=1e-4)

    # --- Case D: bf16 logits consumed natively (f32 accumulation in-kernel) ---
    Nd, Cd = 16, 256
    xd = jax.random.normal(keys[8], (Nd, Cd), dtype=jnp.bfloat16)
    ld = jax.random.randint(keys[9], (Nd,), 0, Cd, dtype=jnp.int32)
    loss_d = jax.block_until_ready(ce(xd, ld))
    lpd = jax.nn.log_softmax(xd.astype(jnp.float32), axis=-1)
    ref_d = jnp.mean(-jnp.take_along_axis(lpd, ld[:, None], axis=-1)[:, 0])
    assert np.allclose(float(loss_d), float(ref_d), atol=1e-2, rtol=1e-2)

    print("KERNEL_OK")
</pallas_src>

<mosaic_0001>
module attributes {stable_mosaic.version = 11 : i64} {
  func.func @_ce_kernel_hard(%arg0: i32, %arg1: i32, %arg2: memref<8x32xf32, #tpu.memory_space<vmem>>, %arg3: memref<8x1xi32, #tpu.memory_space<vmem>>, %arg4: memref<8x1xf32, #tpu.memory_space<vmem>>, %arg5: memref<8x1xf32, #tpu.memory_space<vmem>>, %arg6: memref<8x1xf32, #tpu.memory_space<vmem>>, %arg7: memref<8x1xf32, #tpu.memory_space<vmem>>, %arg8: memref<8x1xf32, #tpu.memory_space<vmem>>) attributes {dimension_semantics = [#tpu.dimension_semantics<parallel>, #tpu.dimension_semantics<arbitrary>], iteration_bounds = array<i64: 1, 1>, scalar_prefetch = 0 : i64, scratch_operands = 4 : i64, tpu.core_type = #tpu.core_type<tc>, window_params = [{transform_indices = @transform_0, window_bounds = array<i64: 8, 32>}, {transform_indices = @transform_1, window_bounds = array<i64: 8, 1>}, {transform_indices = @transform_2, window_bounds = array<i64: 8, 1>}]} {
    %c0_i32 = arith.constant 0 : i32
    %0 = arith.cmpi eq, %arg1, %c0_i32 : i32
    %1 = arith.extui %0 : i1 to i32
    %c0_i32_0 = arith.constant 0 : i32
    %2 = arith.cmpi ne, %1, %c0_i32_0 : i32
    scf.if %2 {
      %cst_26 = arith.constant 0xFF800000 : f32
      %43 = vector.broadcast %cst_26 : f32 to vector<8x1xf32>
      %c0_27 = arith.constant 0 : index
      %c0_28 = arith.constant 0 : index
      %44 = vector.load %arg5[%c0_27, %c0_28] : memref<8x1xf32, #tpu.memory_space<vmem>>, vector<8x1xf32>
      tpu.vector_store %arg5[%c0_27, %c0_28], %43 {strides = array<i32>} : memref<8x1xf32, #tpu.memory_space<vmem>>, vector<8x1xf32>,
      %cst_29 = arith.constant 0.000000e+00 : f32
      %45 = vector.broadcast %cst_29 : f32 to vector<8x1xf32>
      %c0_30 = arith.constant 0 : index
      %c0_31 = arith.constant 0 : index
      %46 = vector.load %arg6[%c0_30, %c0_31] : memref<8x1xf32, #tpu.memory_space<vmem>>, vector<8x1xf32>
      tpu.vector_store %arg6[%c0_30, %c0_31], %45 {strides = array<i32>} : memref<8x1xf32, #tpu.memory_space<vmem>>, vector<8x1xf32>,
      %cst_32 = arith.constant 0.000000e+00 : f32
      %47 = vector.broadcast %cst_32 : f32 to vector<8x1xf32>
      %c0_33 = arith.constant 0 : index
      %c0_34 = arith.constant 0 : index
      %48 = vector.load %arg7[%c0_33, %c0_34] : memref<8x1xf32, #tpu.memory_space<vmem>>, vector<8x1xf32>
      tpu.vector_store %arg7[%c0_33, %c0_34], %47 {strides = array<i32>} : memref<8x1xf32, #tpu.memory_space<vmem>>, vector<8x1xf32>,
      %cst_35 = arith.constant 0.000000e+00 : f32
      %49 = vector.broadcast %cst_35 : f32 to vector<8x1xf32>
      %c0_36 = arith.constant 0 : index
      %c0_37 = arith.constant 0 : index
      %50 = vector.load %arg8[%c0_36, %c0_37] : memref<8x1xf32, #tpu.memory_space<vmem>>, vector<8x1xf32>
      tpu.vector_store %arg8[%c0_36, %c0_37], %49 {strides = array<i32>} : memref<8x1xf32, #tpu.memory_space<vmem>>, vector<8x1xf32>,
    } else {
    }
    %c0 = arith.constant 0 : index
    %c0_1 = arith.constant 0 : index
    %3 = vector.load %arg2[%c0, %c0_1] : memref<8x32xf32, #tpu.memory_space<vmem>>, vector<8x32xf32>
    %c0_2 = arith.constant 0 : index
    %c0_3 = arith.constant 0 : index
    %4 = vector.load %arg3[%c0_2, %c0_3] : memref<8x1xi32, #tpu.memory_space<vmem>>, vector<8x1xi32>
    %c32_i32 = arith.constant 32 : i32
    %5 = arith.muli %arg1, %c32_i32 : i32
    %6 = tpu.iota {dimensions = array<i32: 1>} : vector<1x32xi32>
    %7 = vector.broadcast %5 : i32 to vector<1x32xi32>
    %8 = arith.addi %7, %6 : vector<1x32xi32>
    %c0_4 = arith.constant 0 : index
    %c0_5 = arith.constant 0 : index
    %9 = vector.load %arg5[%c0_4, %c0_5] : memref<8x1xf32, #tpu.memory_space<vmem>>, vector<8x1xf32>
    %cst = arith.constant dense<0xFF800000> : vector<8xf32>
    %10 = vector.multi_reduction <maximumf>, %3, %cst [1] : vector<8x32xf32> to vector<8xf32>
    %11 = vector.shape_cast %10 : vector<8xf32> to vector<8x1xf32>
    %12 = arith.maximumf %9, %11 : vector<8x1xf32>
    %13 = arith.subf %9, %12 : vector<8x1xf32>
    %14 = math.exp %13 : vector<8x1xf32>
    %c0_6 = arith.constant 0 : index
    %c0_7 = arith.constant 0 : index
    %15 = vector.load %arg6[%c0_6, %c0_7] : memref<8x1xf32, #tpu.memory_space<vmem>>, vector<8x1xf32>
    %16 = arith.mulf %14, %15 : vector<8x1xf32>
    %17 = vector.broadcast %12 : vector<8x1xf32> to vector<8x32xf32>
    %18 = arith.subf %3, %17 : vector<8x32xf32>
    %19 = math.exp %18 : vector<8x32xf32>
    %cst_8 = arith.constant dense<0.000000e+00> : vector<8xf32>
    %20 = vector.multi_reduction <add>, %19, %cst_8 [1] : vector<8x32xf32> to vector<8xf32>
    %21 = vector.shape_cast %20 : vector<8xf32> to vector<8x1xf32>
    %22 = arith.addf %16, %21 : vector<8x1xf32>
    %c0_9 = arith.constant 0 : index
    %c0_10 = arith.constant 0 : index
    %23 = vector.load %arg6[%c0_9, %c0_10] : memref<8x1xf32, #tpu.memory_space<vmem>>, vector<8x1xf32>
    tpu.vector_store %arg6[%c0_9, %c0_10], %22 {strides = array<i32>} : memref<8x1xf32, #tpu.memory_space<vmem>>, vector<8x1xf32>,
    %c0_11 = arith.constant 0 : index
    %c0_12 = arith.constant 0 : index
    %24 = vector.load %arg5[%c0_11, %c0_12] : memref<8x1xf32, #tpu.memory_space<vmem>>, vector<8x1xf32>
    tpu.vector_store %arg5[%c0_11, %c0_12], %12 {strides = array<i32>} : memref<8x1xf32, #tpu.memory_space<vmem>>, vector<8x1xf32>,
    %c0_13 = arith.constant 0 : index
    %c0_14 = arith.constant 0 : index
    %25 = vector.load %arg8[%c0_13, %c0_14] : memref<8x1xf32, #tpu.memory_space<vmem>>, vector<8x1xf32>
    %26 = vector.broadcast %8 : vector<1x32xi32> to vector<8x32xi32>
    %27 = vector.broadcast %4 : vector<8x1xi32> to vector<8x32xi32>
    %28 = arith.cmpi eq, %26, %27 : vector<8x32xi32>
    %cst_15 = arith.constant 0.000000e+00 : f32
    %29 = vector.broadcast %cst_15 : f32 to vector<8x32xf32>
    %30 = arith.select %28, %3, %29 : vector<8x32xi1>, vector<8x32xf32>
    %cst_16 = arith.constant dense<0.000000e+00> : vector<8xf32>
    %31 = vector.multi_reduction <add>, %30, %cst_16 [1] : vector<8x32xf32> to vector<8xf32>
    %32 = vector.shape_cast %31 : vector<8xf32> to vector<8x1xf32>
    %33 = arith.addf %25, %32 : vector<8x1xf32>
    %c0_17 = arith.constant 0 : index
    %c0_18 = arith.constant 0 : index
    %34 = vector.load %arg8[%c0_17, %c0_18] : memref<8x1xf32, #tpu.memory_space<vmem>>, vector<8x1xf32>
    tpu.vector_store %arg8[%c0_17, %c0_18], %33 {strides = array<i32>} : memref<8x1xf32, #tpu.memory_space<vmem>>, vector<8x1xf32>,
    %c0_19 = arith.constant 0 : index
    %c0_20 = arith.constant 0 : index
    %35 = vector.load %arg7[%c0_19, %c0_20] : memref<8x1xf32, #tpu.memory_space<vmem>>, vector<8x1xf32>
    %cst_21 = arith.constant dense<0.000000e+00> : vector<8xf32>
    %36 = vector.multi_reduction <add>, %3, %cst_21 [1] : vector<8x32xf32> to vector<8xf32>
    %37 = vector.shape_cast %36 : vector<8xf32> to vector<8x1xf32>
    %38 = arith.addf %35, %37 : vector<8x1xf32>
    %c0_22 = arith.constant 0 : index
    %c0_23 = arith.constant 0 : index
    %39 = vector.load %arg7[%c0_22, %c0_23] : memref<8x1xf32, #tpu.memory_space<vmem>>, vector<8x1xf32>
    tpu.vector_store %arg7[%c0_22, %c0_23], %38 {strides = array<i32>} : memref<8x1xf32, #tpu.memory_space<vmem>>, vector<8x1xf32>,
    %c0_i32_24 = arith.constant 0 : i32
    %40 = arith.cmpi eq, %arg1, %c0_i32_24 : i32
    %41 = arith.extui %40 : i1 to i32
    %c0_i32_25 = arith.constant 0 : i32
    %42 = arith.cmpi ne, %41, %c0_i32_25 : i32
    scf.if %42 {
      %c0_26 = arith.constant 0 : index
      %c0_27 = arith.constant 0 : index
      %43 = vector.load %arg5[%c0_26, %c0_27] : memref<8x1xf32, #tpu.memory_space<vmem>>, vector<8x1xf32>
      %c0_28 = arith.constant 0 : index
      %c0_29 = arith.constant 0 : index
      %44 = vector.load %arg6[%c0_28, %c0_29] : memref<8x1xf32, #tpu.memory_space<vmem>>, vector<8x1xf32>
      %45 = math.log %44 : vector<8x1xf32>
      %46 = arith.addf %43, %45 : vector<8x1xf32>
      %c0_30 = arith.constant 0 : index
      %c0_31 = arith.constant 0 : index
      %47 = vector.load %arg8[%c0_30, %c0_31] : memref<8x1xf32, #tpu.memory_space<vmem>>, vector<8x1xf32>
      %48 = arith.subf %46, %47 : vector<8x1xf32>
      %cst_32 = arith.constant 3.200000e+01 : f32
      %49 = vector.broadcast %cst_32 : f32 to vector<8x1xf32>
      %50 = arith.mulf %49, %46 : vector<8x1xf32>
      %c0_33 = arith.constant 0 : index
      %c0_34 = arith.constant 0 : index
      %51 = vector.load %arg7[%c0_33, %c0_34] : memref<8x1xf32, #tpu.memory_space<vmem>>, vector<8x1xf32>
      %52 = arith.subf %50, %51 : vector<8x1xf32>
      %cst_35 = arith.constant 0.899999976 : f32
      %53 = vector.broadcast %cst_35 : f32 to vector<8x1xf32>
      %54 = arith.mulf %53, %48 : vector<8x1xf32>
      %cst_36 = arith.constant 3.125000e-03 : f32
      %55 = vector.broadcast %cst_36 : f32 to vector<8x1xf32>
      %56 = arith.mulf %55, %52 : vector<8x1xf32>
      %57 = arith.addf %54, %56 : vector<8x1xf32>
      %c0_37 = arith.constant 0 : index
      %c0_38 = arith.constant 0 : index
      %58 = vector.load %arg4[%c0_37, %c0_38] : memref<8x1xf32, #tpu.memory_space<vmem>>, vector<8x1xf32>
      tpu.vector_store %arg4[%c0_37, %c0_38], %57 {strides = array<i32>} : memref<8x1xf32, #tpu.memory_space<vmem>>, vector<8x1xf32>,
    } else {
    }
    return
  }
  func.func @transform_0(%arg0: i32, %arg1: i32) -> (i32, i32) {
    %c0_i32 = arith.constant 0 : i32
    return %arg0, %arg1 : i32, i32
  }
  func.func @transform_1(%arg0: i32, %arg1: i32) -> (i32, i32) {
    %c0_i32 = arith.constant 0 : i32
    %c0_i32_0 = arith.constant 0 : i32
    return %arg0, %c0_i32 : i32, i32
  }
  func.func @transform_2(%arg0: i32, %arg1: i32) -> (i32, i32) {
    %c0_i32 = arith.constant 0 : i32
    %c0_i32_0 = arith.constant 0 : i32
    return %arg0, %c0_i32 : i32, i32
  }
}

</mosaic_0001>

<bundles_post_ra>
// kernel: tpu_custom_call.1
= control target key start
LH: loop header
LB: loop body
LE: loop exit
PB: predicated region body
PF: predicated region fallthrough
CT: control target
= control target key end

     0   :  { %vm28_vm0 = vcmask 261120   ;;  %vm15_vm1 = vcmask 7168   ;;  %v102_v1 = vmov -inf   ;;  %v103_v3 = vmov 0   ;;  %s142_s0 = inlined_call_operand.vmem [shape: f32[8,32], index: 0, kind: input, shape index: {}]   ;;  %s143_s1 = inlined_call_operand.vmem [shape: s32[8,1], index: 1, kind: input, shape index: {}]   ;;  %s144_s2 = inlined_call_operand.vmem [shape: f32[8,1], index: 2, kind: output, shape index: {}]  }
   0x1   :  { %v20_v0 = vld [vmem:[%s142_s0] sm:$0xff]  ;;  %16 = vst.msk [vmem:[#allocation2] sm:$0xff] %vm15_vm1, %v102_v1  ;;  %94 = vset.pattern.permute.xlu0 %v103_v3  ;;  %95 = vset.pattern.permute.xlu1 %v103_v3  ;;  %v104_v4 = vmov 0.0   ;;  %v23_v10 = vlaneseq }
   0x2   :  { %v29_v2 = vsel %vm28_vm0, %v20_v0, -inf  ;;  %17 = vst.msk [vmem:[#allocation3] sm:$0xff] %vm15_vm1, %v104_v4  ;;  %v21_v5 = vld [vmem:[%s143_s1] sm:$0xff]  ;;  %v65_v15 = vsel %vm28_vm0, %v20_v0, 0.0 }
   0x3   :  { %30 = vmax.xlane.f32.xlu0 %v29_v2  ;;  %18 = vst.msk [vmem:[#allocation4] sm:$0xff] %vm15_vm1, %v104_v4  ;;  %55 = vperm.xlu1 %95, %v21_v5   ;;  %v24_v11 = vand.u32 127, %v23_v10 }
   0x4   :  { %19 = vst.msk [vmem:[#allocation5] sm:$0xff] %vm15_vm1, %v104_v4 }
   0x8   :  { %v27_v6 = vld [vmem:[#allocation2] sm:$0xff] }
   0x9   :  { %v36_v29 = vld [vmem:[#allocation3] sm:$0xff] }
   0xa   :  { %v64_v24 = vld [vmem:[#allocation4] sm:$0xff] }
   0xb   :  { %v53_v21 = vld [vmem:[#allocation5] sm:$0xff] }
  0x75   :  { %v56_v12 = vpop.permute.xlu1 %55 }
  0x76   :  { %v31_v7 = vpop.xlane.xlu0 %30  ;;  %vm57_vm2 = vcmp.eq.s32.totalorder %v24_v11, %v56_v12 }
  0x77   :  { %v32_v8 = vmax.f32 %v27_v6, %v31_v7  ;;  %v58_v13 = vsel %vm57_vm2, %v20_v0, 0.0 }
  0x78   :  { %v59_v14 = vsel %vm28_vm0, %v58_v13, 0.0 }
  0x79   :  { %v33_v9 = vsub.f32 %v27_v6, %v32_v8  ;;  %52 = vst.msk [vmem:[#allocation2] sm:$0xff] %vm15_vm1, %v32_v8  ;;  %40 = vperm.xlu0 %94, %v32_v8   ;;  %60 = vadd.xlane.f32.xlu2 %v59_v14 }
  0x7b   :  { %v34_v27 = vmul.f32 1.442695, %v33_v9 }
  0x80   :  { %v73_v36 = vld [vmem:[#allocation2] sm:$0xff] }
  0x81   :  { %66 = vadd.xlane.f32.xlu2 %v65_v15 }
  0xeb   :  { %v41_v16 = vpop.permute.xlu0 %40 }
  0xec   :  { %v43_v17 = vsub.f32 %v20_v0, %v41_v16  ;;  %v61_v22 = vpop.xlane.xlu2 %60 }
  0xed   :  { %v62_v23 = vadd.f32 %v61_v22, %v53_v21 }
  0xee   :  { %v44_v18 = vmul.f32 1.442695, %v43_v17 }
  0xef   :  { %63 = vst.msk [vmem:[#allocation5] sm:$0xff] %vm15_vm1, %v62_v23 }
  0xf0   :  { %96 = vpow2.f32 %v44_v18 }
  0xf1   :  { %98 = vpow2.f32 %v34_v27 }
  0xf4   :  { %v67_v25 = vpop.xlane.xlu2 %66 }
  0xf5   :  { %v68_v26 = vadd.f32 %v67_v25, %v64_v24 }
  0xf6   :  { %v97_v19 = vpop.eup %96  ;;  %v78_v38 = vld [vmem:[#allocation5] sm:$0xff] }
  0xf7   :  { %v46_v20 = vsel %vm28_vm0, %v97_v19, 0.0  ;;  %69 = vst.msk [vmem:[#allocation4] sm:$0xff] %vm15_vm1, %v68_v26  ;;  %v99_v28 = vpop.eup %98 }
  0xf8   :  { %47 = vadd.xlane.f32.xlu1 %v46_v20  ;;  %v37_v30 = vmul.f32 %v99_v28, %v36_v29 }
  0xfe   :  { %v81_v39 = vld [vmem:[#allocation4] sm:$0xff] }
 0x16b   :  { %v48_v31 = vpop.xlane.xlu1 %47 }
 0x16c   :  { %v49_v32 = vadd.f32 %v48_v31, %v37_v30 }
 0x16e   :  { %51 = vst.msk [vmem:[#allocation3] sm:$0xff] %vm15_vm1, %v49_v32 }
 0x175   :  { %v74_v33 = vld [vmem:[#allocation3] sm:$0xff] }
 0x176   :  { %100 = vlog2.f32 %v74_v33 }
 0x17c   :  { %v101_v34 = vpop.eup %100 }
 0x17d   :  { %v76_v35 = vmul.f32 0.6931472, %v101_v34 }
 0x17f   :  { %v77_v37 = vadd.f32 %v76_v35, %v73_v36 }
 0x181   :  { %v79_v40 = vsub.f32 %v77_v37, %v78_v38  ;;  %v80_v41 = vmul.f32 32.0, %v77_v37 }
 0x183   :  { %v82_v42 = vsub.f32 %v80_v41, %v81_v39  ;;  %v83_v43 = vmul.f32 0.9, %v79_v40 }
 0x185   :  { %v84_v44 = vmul.f32 0.003125, %v82_v42 }
 0x187   :  { %v85_v45 = vadd.f32 %v84_v44, %v83_v43 }
 0x189   :  { %86 = vst.msk [vmem:[%s144_s2] sm:$0xff] %vm15_vm1, %v85_v45 }

</bundles_post_ra>
